<compile_context>
chip_gen: v5e
topology: v5e:2x2
jax: 0.10.0
libtpu: 0.0.40
codegen_flags: <defaults>
</compile_context>

<pallas_src>
import math

import jax
import jax.numpy as jnp
from jax.experimental import pallas as pl
from jax.experimental.pallas import tpu as pltpu

EPS = 1e-5  # torch nn.LayerNorm default eps


def _patch_merge_kernel(x_ref, w_ref, b_ref, o_ref, y_ref):
    # x_ref: (th, 2, Wp, 2C) bf16 -- one contiguous tile of the merged view.
    #        [:, 0] = even input rows, feature order [x0 | x2]
    #        [:, 1] = odd  input rows, feature order [x1 | x3]
    # w_ref: (4C, N) bf16 -- gamma-folded weight, rows ordered [x0|x2|x1|x3]
    # b_ref: (1, N)  f32  -- beta @ W
    # o_ref: (th*Wp, N)
    # y_ref: (th*Wp, 4C) bf16 VMEM scratch for normalized activations.
    th, _, wp, c2 = x_ref.shape
    k = 2 * c2                       # = 4*C, LayerNorm width
    inv_k = 1.0 / float(k)
    rows = th * wp

    x = x_ref[...]
    x_top = x[:, 0].astype(jnp.float32)      # (th, Wp, 2C)  [x0 | x2]
    x_bot = x[:, 1].astype(jnp.float32)      # (th, Wp, 2C)  [x1 | x3]

    # One-pass LayerNorm statistics over the full 4C features (split across
    # the two halves; the sums are permutation-invariant so no concat needed).
    s1 = (jnp.sum(x_top, axis=-1, keepdims=True)
          + jnp.sum(x_bot, axis=-1, keepdims=True))
    s2 = (jnp.sum(x_top * x_top, axis=-1, keepdims=True)
          + jnp.sum(x_bot * x_bot, axis=-1, keepdims=True))
    mean = s1 * inv_k
    var = jnp.maximum(s2 * inv_k - mean * mean, 0.0)
    inv_std = jax.lax.rsqrt(var + EPS)

    # NOTE: the (th, Wp, 2C) -> (th*Wp, 2C) reshape is a free reinterpretation
    # when Wp % 8 == 0 (sublane aligned); otherwise the compiler inserts a
    # correct (but paid-for) relayout copy.
    yt = ((x_top - mean) * inv_std).reshape(rows, c2).astype(jnp.bfloat16)
    yb = ((x_bot - mean) * inv_std).reshape(rows, c2).astype(jnp.bfloat16)
    y_ref[:, 0:c2] = yt
    y_ref[:, c2:2 * c2] = yb

    # Single K=4C matmul on the MXU with f32 accumulation.
    acc = jnp.dot(y_ref[...], w_ref[...], preferred_element_type=jnp.float32)
    o_ref[...] = (acc + b_ref[...]).astype(o_ref.dtype)


def fold_patch_merging_params(gamma, beta, w_reduction):
    """One-time (param-load) transform.

    Folds the LayerNorm affine into the bias-free Linear, reorders the weight
    rows to the kernel's in-VMEM feature order [x0 | x2 | x1 | x3], and casts
    the weight to bf16 (MXU operand dtype).
    Returns (w_fused bf16 (4C, N), bias f32 (1, N)).
    """
    k, n = w_reduction.shape
    c = k // 4
    wf = gamma.astype(jnp.float32)[:, None] * w_reduction.astype(jnp.float32)
    w_fused = jnp.concatenate(
        [wf[0:c], wf[2 * c:3 * c], wf[c:2 * c], wf[3 * c:4 * c]], axis=0
    ).astype(jnp.bfloat16)
    bias = beta.astype(jnp.float32)[None, :] @ w_reduction.astype(jnp.float32)
    return w_fused, bias


def _tpu_vmem_capacity_bytes():
    try:
        info = pltpu.get_tpu_info()
        cap = getattr(info, "vmem_capacity_bytes", None)
        if cap:
            return int(cap)
    except Exception:
        pass
    return 128 << 20     # v5e/v6e-class default if the query is unavailable


def _vmem_limit_bytes():
    # 48 MiB on 128-MiB parts (v5e/v6e; above v5e's 16-MiB default scoped
    # limit), half of physical VMEM (32 MiB) on v7x's 64-MiB parts.
    return min(48 << 20, _tpu_vmem_capacity_bytes() // 2)


def _pick_row_tile(groups, wp, c, n):
    """One 'group' = one merged output row of Wp tokens."""
    vmem_cap = _tpu_vmem_capacity_bytes()
    two_cores = vmem_cap <= (96 << 20)   # v7x-class: 64 MiB VMEM/TC, 2 TCs
    row_target = 512 if two_cores else 1024     # output rows per grid step
    budget = (12 << 20) if two_cores else (20 << 20)

    k4 = 4 * c
    # Per-group VMEM footprint: double-buffered bf16 input + output blocks,
    # bf16 y-scratch, f32 elementwise temporaries and the f32 accumulator.
    per_group = wp * (2 * k4 * 2      # 2x bf16 input buffers
                      + 2 * n * 2     # 2x bf16 output buffers
                      + k4 * 2        # bf16 y scratch
                      + 2 * k4 * 4    # f32 x_top/x_bot-sized temporaries
                      + n * 4)        # f32 accumulator
    th = max(1, row_target // max(wp, 1))
    th = min(th, max(1, budget // max(per_group, 1)))

    if two_cores and groups >= 2:
        th = min(th, pl.cdiv(groups, 2))          # >= 2 grid steps for 2 TCs
        steps = pl.cdiv(groups, th)
        if steps > 1 and steps % 2 == 1:
            th = max(1, pl.cdiv(groups, steps + 1))   # even step count
    th = min(th, groups)

    # (8,128) layout rule for the flattened (th*Wp, N) output block:
    # th*Wp must be a multiple of 8 unless the block spans the full row dim.
    if th < groups:
        m = 8 // math.gcd(wp, 8)
        th = (th // m) * m
        if th <= 0:
            th = groups
    return max(1, th)


def patch_merging_forward(x, w_fused, bias, input_resolution, *,
                          row_tile=None, act_dtype=jnp.bfloat16,
                          out_dtype=jnp.bfloat16):
    """x: (B, H*W, C) -> (B, (H/2)*(W/2), 2*C). Params already folded."""
    H = W = input_resolution
    B, L, C = x.shape
    assert L == H * W, "input feature has wrong size"
    assert H % 2 == 0 and W % 2 == 0, f"x size ({H}*{W}) are not even."
    Hp, Wp = H // 2, W // 2
    groups = B * Hp
    K, N = w_fused.shape
    assert K == 4 * C and bias.shape == (1, N)

    # bf16 HBM I/O (kernel is HBM-bound) + free (copy-less) merged view:
    # (B, H*W, C) == (B*Hp, 2, Wp, 2*C) in memory.  dim1 = input-row parity;
    # the last dim packs (column parity, channel) -> [x0|x2] / [x1|x3].
    xr = x.astype(act_dtype).reshape(groups, 2, Wp, 2 * C)

    th = row_tile if row_tile is not None else _pick_row_tile(groups, Wp, C, N)
    rows = th * Wp
    grid = (pl.cdiv(groups, th),)

    out = pl.pallas_call(
        _patch_merge_kernel,
        out_shape=jax.ShapeDtypeStruct((groups * Wp, N), out_dtype),
        grid_spec=pltpu.PrefetchScalarGridSpec(
            num_scalar_prefetch=0,
            grid=grid,
            in_specs=[
                # one contiguous tile carrying both even/odd input rows
                pl.BlockSpec((th, 2, Wp, 2 * C), lambda i: (i, 0, 0, 0)),
                pl.BlockSpec((4 * C, N), lambda i: (0, 0)),   # fused weight
                pl.BlockSpec((1, N), lambda i: (0, 0)),       # folded bias
            ],
            out_specs=pl.BlockSpec((rows, N), lambda i: (i, 0)),
            scratch_shapes=[pltpu.VMEM((rows, 4 * C), jnp.bfloat16)],
        ),
        compiler_params=pltpu.CompilerParams(
            dimension_semantics=("parallel",),
            vmem_limit_bytes=_vmem_limit_bytes(),
        ),
    )(xr, w_fused, bias)

    return out.reshape(B, Hp * Wp, N)


def _reference(x, gamma, beta, w_reduction, input_resolution):
    H = W = input_resolution
    B, L, C = x.shape
    xg = x.reshape(B, H, W, C)
    x0 = xg[:, 0::2, 0::2, :]
    x1 = xg[:, 1::2, 0::2, :]
    x2 = xg[:, 0::2, 1::2, :]
    x3 = xg[:, 1::2, 1::2, :]
    xm = jnp.concatenate([x0, x1, x2, x3], axis=-1).reshape(B, -1, 4 * C)
    mean = jnp.mean(xm, axis=-1, keepdims=True)
    var = jnp.mean((xm - mean) ** 2, axis=-1, keepdims=True)
    xn = (xm - mean) / jnp.sqrt(var + EPS) * gamma + beta
    return xn @ w_reduction


if __name__ == "__main__":
    key = jax.random.PRNGKey(0)
    # dim=64 keeps the demo small while making N=2C=128 lane-dense and
    # 4C=256 MXU-friendly (perf review: do not tune on N=64).
    B, input_resolution, dim = 2, 16, 64       # L = 256
    k_x, k_w, k_g, k_b = jax.random.split(key, 4)

    x = jax.random.normal(
        k_x, (B, input_resolution * input_resolution, dim), dtype=jnp.float32)

    # Non-trivial LN affine so the gamma/beta weight-folding path is exercised.
    gamma = 1.0 + 0.1 * jax.random.normal(k_g, (4 * dim,), dtype=jnp.float32)
    beta = 0.1 * jax.random.normal(k_b, (4 * dim,), dtype=jnp.float32)
    # nn.Linear(4*dim, 2*dim, bias=False) weight, stored as (in, out) for x @ W
    w_reduction = (jax.random.normal(k_w, (4 * dim, 2 * dim), dtype=jnp.float32)
                   * (1.0 / jnp.sqrt(4.0 * dim)))

    # One-time param-load transform (fold LN affine, reorder rows, cast bf16).
    w_fused, bias = fold_patch_merging_params(gamma, beta, w_reduction)

    out = patch_merging_forward(x, w_fused, bias, input_resolution)
    out = jax.block_until_ready(out)

    ref = _reference(x, gamma, beta, w_reduction, input_resolution)
    assert out.shape == (B, (input_resolution // 2) ** 2, 2 * dim), out.shape
    # bf16 HBM I/O + bf16 MXU operands (f32 accumulation) -> loose tolerance
    # vs the all-f32 reference.
    assert jnp.allclose(out.astype(jnp.float32), ref, atol=5e-2, rtol=5e-2), \
        "mismatch vs reference"

    print("KERNEL_OK")
</pallas_src>

<mosaic_0001>
module attributes {stable_mosaic.version = 11 : i64} {
  func.func @_patch_merge_kernel(%arg0: i32, %arg1: memref<16x2x8x128xbf16, #tpu.memory_space<vmem>>, %arg2: memref<256x128xbf16, #tpu.memory_space<vmem>>, %arg3: memref<1x128xf32, #tpu.memory_space<vmem>>, %arg4: memref<128x128xbf16, #tpu.memory_space<vmem>>, %arg5: memref<128x256xbf16, #tpu.memory_space<vmem>>) attributes {dimension_semantics = [#tpu.dimension_semantics<parallel>], iteration_bounds = array<i64: 1>, scalar_prefetch = 0 : i64, scratch_operands = 1 : i64, tpu.core_type = #tpu.core_type<tc>, window_params = [{transform_indices = @transform_0, window_bounds = array<i64: 16, 2, 8, 128>}, {pipeline_mode = #tpu.pipeline_mode<synchronous>, transform_indices = @transform_1, window_bounds = array<i64: 256, 128>}, {pipeline_mode = #tpu.pipeline_mode<synchronous>, transform_indices = @transform_2, window_bounds = array<i64: 1, 128>}, {transform_indices = @transform_3, window_bounds = array<i64: 128, 128>}]} {
    %c0 = arith.constant 0 : index
    %c0_0 = arith.constant 0 : index
    %c0_1 = arith.constant 0 : index
    %c0_2 = arith.constant 0 : index
    %0 = vector.load %arg1[%c0, %c0_0, %c0_1, %c0_2] : memref<16x2x8x128xbf16, #tpu.memory_space<vmem>>, vector<16x2x8x128xbf16>
    %1 = vector.extract_strided_slice %0 {offsets = [0, 0, 0, 0], sizes = [16, 1, 8, 128], strides = [1, 1, 1, 1]} : vector<16x2x8x128xbf16> to vector<16x1x8x128xbf16>
    %2 = vector.shape_cast %1 : vector<16x1x8x128xbf16> to vector<16x8x128xbf16>
    %3 = arith.extf %2 : vector<16x8x128xbf16> to vector<16x8x128xf32>
    %4 = vector.extract_strided_slice %0 {offsets = [0, 1, 0, 0], sizes = [16, 1, 8, 128], strides = [1, 1, 1, 1]} : vector<16x2x8x128xbf16> to vector<16x1x8x128xbf16>
    %5 = vector.shape_cast %4 : vector<16x1x8x128xbf16> to vector<16x8x128xbf16>
    %6 = arith.extf %5 : vector<16x8x128xbf16> to vector<16x8x128xf32>
    %cst = arith.constant dense<0.000000e+00> : vector<16x8xf32>
    %7 = vector.multi_reduction <add>, %3, %cst [2] : vector<16x8x128xf32> to vector<16x8xf32>
    %8 = vector.shape_cast %7 : vector<16x8xf32> to vector<16x8x1xf32>
    %cst_3 = arith.constant dense<0.000000e+00> : vector<16x8xf32>
    %9 = vector.multi_reduction <add>, %6, %cst_3 [2] : vector<16x8x128xf32> to vector<16x8xf32>
    %10 = vector.shape_cast %9 : vector<16x8xf32> to vector<16x8x1xf32>
    %11 = arith.addf %8, %10 : vector<16x8x1xf32>
    %12 = arith.mulf %3, %3 : vector<16x8x128xf32>
    %cst_4 = arith.constant dense<0.000000e+00> : vector<16x8xf32>
    %13 = vector.multi_reduction <add>, %12, %cst_4 [2] : vector<16x8x128xf32> to vector<16x8xf32>
    %14 = vector.shape_cast %13 : vector<16x8xf32> to vector<16x8x1xf32>
    %15 = arith.mulf %6, %6 : vector<16x8x128xf32>
    %cst_5 = arith.constant dense<0.000000e+00> : vector<16x8xf32>
    %16 = vector.multi_reduction <add>, %15, %cst_5 [2] : vector<16x8x128xf32> to vector<16x8xf32>
    %17 = vector.shape_cast %16 : vector<16x8xf32> to vector<16x8x1xf32>
    %18 = arith.addf %14, %17 : vector<16x8x1xf32>
    %cst_6 = arith.constant 3.906250e-03 : f32
    %19 = vector.broadcast %cst_6 : f32 to vector<16x8x1xf32>
    %20 = arith.mulf %11, %19 : vector<16x8x1xf32>
    %cst_7 = arith.constant 3.906250e-03 : f32
    %21 = vector.broadcast %cst_7 : f32 to vector<16x8x1xf32>
    %22 = arith.mulf %18, %21 : vector<16x8x1xf32>
    %23 = arith.mulf %20, %20 : vector<16x8x1xf32>
    %24 = arith.subf %22, %23 : vector<16x8x1xf32>
    %cst_8 = arith.constant 0.000000e+00 : f32
    %25 = vector.broadcast %cst_8 : f32 to vector<16x8x1xf32>
    %26 = arith.maximumf %24, %25 : vector<16x8x1xf32>
    %cst_9 = arith.constant 9.99999974E-6 : f32
    %27 = vector.broadcast %cst_9 : f32 to vector<16x8x1xf32>
    %28 = arith.addf %26, %27 : vector<16x8x1xf32>
    %29 = math.rsqrt %28 : vector<16x8x1xf32>
    %30 = vector.broadcast %20 : vector<16x8x1xf32> to vector<16x8x128xf32>
    %31 = arith.subf %3, %30 : vector<16x8x128xf32>
    %32 = vector.broadcast %29 : vector<16x8x1xf32> to vector<16x8x128xf32>
    %33 = arith.mulf %31, %32 : vector<16x8x128xf32>
    %34 = vector.shape_cast %33 : vector<16x8x128xf32> to vector<128x128xf32>
    %35 = arith.truncf %34 : vector<128x128xf32> to vector<128x128xbf16>
    %36 = vector.broadcast %20 : vector<16x8x1xf32> to vector<16x8x128xf32>
    %37 = arith.subf %6, %36 : vector<16x8x128xf32>
    %38 = vector.broadcast %29 : vector<16x8x1xf32> to vector<16x8x128xf32>
    %39 = arith.mulf %37, %38 : vector<16x8x128xf32>
    %40 = vector.shape_cast %39 : vector<16x8x128xf32> to vector<128x128xf32>
    %41 = arith.truncf %40 : vector<128x128xf32> to vector<128x128xbf16>
    %c0_10 = arith.constant 0 : index
    %c0_11 = arith.constant 0 : index
    %42 = vector.load %arg5[%c0_10, %c0_11] : memref<128x256xbf16, #tpu.memory_space<vmem>>, vector<128x128xbf16>
    tpu.vector_store %arg5[%c0_10, %c0_11], %35 {strides = array<i32>} : memref<128x256xbf16, #tpu.memory_space<vmem>>, vector<128x128xbf16>,
    %c0_12 = arith.constant 0 : index
    %c128 = arith.constant 128 : index
    %43 = vector.load %arg5[%c0_12, %c128] : memref<128x256xbf16, #tpu.memory_space<vmem>>, vector<128x128xbf16>
    tpu.vector_store %arg5[%c0_12, %c128], %41 {strides = array<i32>} : memref<128x256xbf16, #tpu.memory_space<vmem>>, vector<128x128xbf16>,
    %c0_13 = arith.constant 0 : index
    %c0_14 = arith.constant 0 : index
    %44 = vector.load %arg5[%c0_13, %c0_14] : memref<128x256xbf16, #tpu.memory_space<vmem>>, vector<128x256xbf16>
    %c0_15 = arith.constant 0 : index
    %c0_16 = arith.constant 0 : index
    %45 = vector.load %arg2[%c0_15, %c0_16] : memref<256x128xbf16, #tpu.memory_space<vmem>>, vector<256x128xbf16>
    %cst_17 = arith.constant dense<0.000000e+00> : vector<128x128xf32>
    %46 = tpu.matmul %44, %45, %cst_17 {dimension_numbers = #tpu.dot_dimension_numbers<[1], [0], [0], [1], [0, 0, 1, 1], [], []>} : vector<128x256xbf16>, vector<256x128xbf16>, vector<128x128xf32> -> vector<128x128xf32>
    %c0_18 = arith.constant 0 : index
    %c0_19 = arith.constant 0 : index
    %47 = vector.load %arg3[%c0_18, %c0_19] : memref<1x128xf32, #tpu.memory_space<vmem>>, vector<1x128xf32>
    %48 = vector.broadcast %47 : vector<1x128xf32> to vector<128x128xf32>
    %49 = arith.addf %46, %48 : vector<128x128xf32>
    %50 = arith.truncf %49 : vector<128x128xf32> to vector<128x128xbf16>
    %c0_20 = arith.constant 0 : index
    %c0_21 = arith.constant 0 : index
    %51 = vector.load %arg4[%c0_20, %c0_21] : memref<128x128xbf16, #tpu.memory_space<vmem>>, vector<128x128xbf16>
    tpu.vector_store %arg4[%c0_20, %c0_21], %50 {strides = array<i32>} : memref<128x128xbf16, #tpu.memory_space<vmem>>, vector<128x128xbf16>,
    return
  }
  func.func @transform_0(%arg0: i32) -> (i32, i32, i32, i32) {
    %c0_i32 = arith.constant 0 : i32
    %c0_i32_0 = arith.constant 0 : i32
    %c0_i32_1 = arith.constant 0 : i32
    %c0_i32_2 = arith.constant 0 : i32
    return %arg0, %c0_i32, %c0_i32_0, %c0_i32_1 : i32, i32, i32, i32
  }
  func.func @transform_1(%arg0: i32) -> (i32, i32) {
    %c0_i32 = arith.constant 0 : i32
    %c0_i32_0 = arith.constant 0 : i32
    %c0_i32_1 = arith.constant 0 : i32
    return %c0_i32, %c0_i32_0 : i32, i32
  }
  func.func @transform_2(%arg0: i32) -> (i32, i32) {
    %c0_i32 = arith.constant 0 : i32
    %c0_i32_0 = arith.constant 0 : i32
    %c0_i32_1 = arith.constant 0 : i32
    return %c0_i32, %c0_i32_0 : i32, i32
  }
  func.func @transform_3(%arg0: i32) -> (i32, i32) {
    %c0_i32 = arith.constant 0 : i32
    %c0_i32_0 = arith.constant 0 : i32
    return %arg0, %c0_i32 : i32, i32
  }
}

</mosaic_0001>

<bundles_post_ra>
// kernel: tpu_custom_call.1
= control target key start
LH: loop header
LB: loop body
LE: loop exit
PB: predicated region body
PF: predicated region fallthrough
CT: control target
= control target key end

     0   :  { %8 = vsyncpa [#allocation4], 0  ;;  %s1859_s0 = inlined_call_operand.hbm [shape: bf16[16,2,8,128], index: 0, kind: input, shape index: {}]   ;;  %s1860_s1 = inlined_call_operand.hbm [shape: bf16[256,128], index: 1, kind: input, shape index: {}]   ;;  %s1861_s2 = inlined_call_operand.vmem [shape: f32[1,128], index: 2, kind: input, shape index: {}]   ;;  %s1862_s3 = inlined_call_operand.hbm [shape: bf16[128,128], index: 3, kind: output, shape index: {}]  }
   0x1   :  { %9 = vsyncpa [#allocation7], 0 }
   0x2   :  { %10 = vsyncpa [#allocation5], 0  ;;  %s15_s14 = sshll.u32 %s1859_s0, 4  ;;  %s1483_s15 = smov [#allocation3]   ;;  %s16_s14 = int_to_ptr.hbm [resolvable:$true] %s15_s14 }
   0x3   :  { %s17_s16 = sshll.u32 %s1483_s15, 4  ;;  %s28_s19 = sshll.u32 %s1860_s1, 4  ;;  %s18_s16 = int_to_ptr.vmem [resolvable:$true] %s17_s16  ;;  %s29_s19 = int_to_ptr.hbm [resolvable:$true] %s28_s19 }
   0x4   :  { %s1484_s20 = smov 64   ;;  %s1485_s21 = smov 4  }
   0x5   :  { %23 = dma.hbm_to_vmem [thread:$0]  %s16_s14, 2048, %s18_s16, [#allocation4], %s1484_s20, %s1484_s20, %s1485_s21  }
   0x6   :  { %s1486_s22 = smov [#allocation6]  }
   0x7   :  { %s30_s23 = sshll.u32 %s1486_s22, 4  ;;  %s31_s23 = int_to_ptr.vmem [resolvable:$true] %s30_s23 }
   0x8   :  { %36 = dma.hbm_to_vmem [thread:$0]  %s29_s19, 2048, %s31_s23, [#allocation7], %s1484_s20, %s1484_s20, %s1485_s21  }
   0x9   :  { %1477 = dma.done.wait [#allocation4], 2048  }
   0xa   :  { %1478 = vsyncadd [#allocation4], 4294965248 }
   0xb   :  { %1479 = dma.done.wait [#allocation7], 2048  }
   0xc   :  { %1480 = vsyncadd [#allocation7], 4294965248  ;;  %v1336_v0 = vld [vmem:[#allocation3 + $0x40] sm:$0xff]   ;;  %v1337_v3 = vld [vmem:[#allocation3 + $0x48] sm:$0xff]   ;;  %s1051_s27 = sshll.u32 %s1862_s3, 4  ;;  %s1052_s27 = int_to_ptr.hbm [resolvable:$true] %s1051_s27 }
   0xd   :  { %v1520_v1 = vunpack.c.h.bf16 %v1336_v0  ;;  %v1522_v2 = vunpack.c.l.bf16 %v1336_v0  ;;  %v1528_v5 = vunpack.c.l.bf16 %v1337_v3  ;;  %v1530_v6 = vunpack.c.h.bf16 %v1337_v3  ;;  %v1226_v8 = vld [vmem:[#allocation3] sm:$0xff]   ;;  %v1329_v12 = vld [vmem:[#allocation3 + $0x8] sm:$0xff]   ;;  %v1338_v19 = vld [vmem:[#allocation3 + $0x50] sm:$0xff]  }
   0xe   :  { %v1540_v11 = vunpack.c.l.bf16 %v1226_v8  ;;  %v1543_v13 = vunpack.c.l.bf16 %v1329_v12  ;;  %v1545_v14 = vunpack.c.h.bf16 %v1226_v8  ;;  %v1547_v15 = vunpack.c.h.bf16 %v1329_v12  ;;  %v1339_v20 = vld [vmem:[#allocation3 + $0x58] sm:$0xff]   ;;  %v1330_v31 = vld [vmem:[#allocation3 + $0x10] sm:$0xff]   ;;  %v1340_v38 = vld [vmem:[#allocation3 + $0x60] sm:$0xff]  }
   0xf   :  { %159 = vadd.xlane.f32.xlu1 %v1520_v1  ;;  %127 = vadd.xlane.f32.xlu0 %v1522_v2  ;;  %v199_v4 = vmul.f32 %v1522_v2, %v1522_v2  ;;  %v200_v7 = vmul.f32 %v1528_v5, %v1528_v5  ;;  %v248_v9 = vmul.f32 %v1530_v6, %v1530_v6  ;;  %v1558_v21 = vunpack.c.l.bf16 %v1338_v19  ;;  %v1331_v30 = vld [vmem:[#allocation3 + $0x18] sm:$0xff]   ;;  %v1341_v42 = vld [vmem:[#allocation3 + $0x68] sm:$0xff]   ;;  %v1332_v49 = vld [vmem:[#allocation3 + $0x20] sm:$0xff]  }
  0x10   :  { %v247_v10 = vmul.f32 %v1520_v1, %v1520_v1  ;;  %v192_v16 = vmul.f32 %v1543_v13, %v1543_v13  ;;  %v191_v17 = vmul.f32 %v1540_v11, %v1540_v11  ;;  %v239_v18 = vmul.f32 %v1545_v14, %v1545_v14  ;;  %v1333_v50 = vld [vmem:[#allocation3 + $0x28] sm:$0xff]   ;;  %v1216_v57 = vld [vmem:[#allocation6 + $0x38] sm:$0xff]  ;;  %v1215_v63 = vld [vmem:[#allocation6 + $0x30] sm:$0xff] }
  0x11   :  { %223 = vadd.xlane.f32.xlu2 %v199_v4  ;;  %v240_v22 = vmul.f32 %v1547_v15, %v1547_v15  ;;  %v1562_v23 = vunpack.c.l.bf16 %v1339_v20  ;;  %v1566_v24 = vunpack.c.h.bf16 %v1339_v20  ;;  %v1568_v25 = vunpack.c.h.bf16 %v1338_v19  ;;  %v1224_v58 = vld [vmem:[#allocation6 + $0x78] sm:$0xff]  ;;  %1351 = vmatpush.bf16.msra.mxu2 %v1216_v57  ;;  %v1223_v0 = vld [vmem:[#allocation6 + $0x70] sm:$0xff]  ;;  %v1222_v8 = vld [vmem:[#allocation6 + $0x68] sm:$0xff] }
  0x12   :  { %v201_v26 = vmul.f32 %v1558_v21, %v1558_v21  ;;  %v1580_v32 = vunpack.c.l.bf16 %v1331_v30  ;;  %v1582_v33 = vunpack.c.l.bf16 %v1330_v31  ;;  %v1584_v34 = vunpack.c.h.bf16 %v1330_v31  ;;  %1359 = vmatpush.bf16.msra.mxu3 %v1224_v58  ;;  %915 = vmatpush.bf16.msra.mxu0 %v1216_v57  ;;  %v1213_v19 = vld [vmem:[#allocation6 + $0x20] sm:$0xff] }
  0x13   :  { %v249_v27 = vmul.f32 %v1568_v25, %v1568_v25  ;;  %v202_v28 = vmul.f32 %v1562_v23, %v1562_v23  ;;  %v250_v29 = vmul.f32 %v1566_v24, %v1566_v24  ;;  %v1591_v36 = vunpack.c.h.bf16 %v1331_v30  ;;  %964 = vmatpush.bf16.msra.mxu1 %v1224_v58  ;;  %v1221_v20 = vld [vmem:[#allocation6 + $0x60] sm:$0xff]  ;;  %v1220_v30 = vld [vmem:[#allocation6 + $0x58] sm:$0xff] }
  0x14   :  { %v193_v35 = vmul.f32 %v1582_v33, %v1582_v33  ;;  %v194_v37 = vmul.f32 %v1580_v32, %v1580_v32  ;;  %v241_v40 = vmul.f32 %v1584_v34, %v1584_v34  ;;  %v1600_v41 = vunpack.c.l.bf16 %v1340_v38 }
  0x15   :  { %v242_v39 = vmul.f32 %v1591_v36, %v1591_v36  ;;  %v1603_v43 = vunpack.c.h.bf16 %v1340_v38  ;;  %v1605_v44 = vunpack.c.l.bf16 %v1341_v42  ;;  %v1607_v45 = vunpack.c.h.bf16 %v1341_v42  ;;  %1352 = vmatpush.bf16.msra.mxu2 %v1215_v63 }
  0x16   :  { %v203_v47 = vmul.f32 %v1600_v41, %v1600_v41  ;;  %v1618_v51 = vunpack.c.l.bf16 %v1332_v49  ;;  %v1622_v53 = vunpack.c.l.bf16 %v1333_v50  ;;  %v1626_v54 = vunpack.c.h.bf16 %v1333_v50  ;;  %1360 = vmatpush.bf16.msra.mxu3 %v1223_v0  ;;  %916 = vmatpush.bf16.msra.mxu0 %v1215_v63 }
  0x17   :  { %161 = vadd.xlane.f32.xlu1 %v1530_v6  ;;  %129 = vadd.xlane.f32.xlu0 %v1528_v5  ;;  %v204_v46 = vmul.f32 %v1605_v44, %v1605_v44  ;;  %v251_v48 = vmul.f32 %v1603_v43, %v1603_v43  ;;  %v252_v52 = vmul.f32 %v1607_v45, %v1607_v45  ;;  %v1628_v55 = vunpack.c.h.bf16 %v1332_v49 }
  0x18   :  { %v195_v56 = vmul.f32 %v1618_v51, %v1618_v51  ;;  %v196_v62 = vmul.f32 %v1622_v53, %v1622_v53  ;;  %v244_v4 = vmul.f32 %v1626_v54, %v1626_v54  ;;  %965 = vmatpush.bf16.msra.mxu1 %v1223_v0 }
  0x19   :  { %225 = vadd.xlane.f32.xlu2 %v200_v7  ;;  %v243_v61 = vmul.f32 %v1628_v55, %v1628_v55  ;;  %v1214_v7 = vld [vmem:[#allocation6 + $0x28] sm:$0xff] }
  0x1a   :  { %1353 = vmatpush.bf16.msra.mxu2 %v1214_v7  ;;  %1361 = vmatpush.bf16.msra.mxu3 %v1222_v8 }
  0x1b   :  { %917 = vmatpush.bf16.msra.mxu0 %v1214_v7  ;;  %v1334_v7 = vld [vmem:[#allocation3 + $0x30] sm:$0xff]  }
  0x1c   :  { %966 = vmatpush.bf16.msra.mxu1 %v1222_v8 }
  0x1e   :  { %1354 = vmatpush.bf16.msra.mxu2 %v1213_v19  ;;  %1362 = vmatpush.bf16.msra.mxu3 %v1221_v20 }
  0x1f   :  { %273 = vadd.xlane.f32.xlu1 %v248_v9  ;;  %271 = vadd.xlane.f32.xlu0 %v247_v10  ;;  %v1343_v9 = vld [vmem:[#allocation3 + $0x78] sm:$0xff]   ;;  %v1342_v10 = vld [vmem:[#allocation3 + $0x70] sm:$0xff]  }
  0x20   :  { %918 = vmatpush.bf16.msra.mxu0 %v1213_v19  ;;  %967 = vmatpush.bf16.msra.mxu1 %v1221_v20  ;;  %v1217_v19 = vld [vmem:[#allocation6 + $0x40] sm:$0xff] }
  0x21   :  { %111 = vadd.xlane.f32.xlu2 %v1540_v11 }
  0x22   :  { %1363 = vmatpush.bf16.msra.mxu3 %v1220_v30 }
  0x24   :  { %968 = vmatpush.bf16.msra.mxu1 %v1220_v30 }
  0x27   :  { %113 = vadd.xlane.f32.xlu0 %v1543_v13  ;;  %143 = vadd.xlane.f32.xlu1 %v1545_v14 }
  0x29   :  { %145 = vadd.xlane.f32.xlu2 %v1547_v15 }
  0x2f   :  { %209 = vadd.xlane.f32.xlu1 %v192_v16  ;;  %207 = vadd.xlane.f32.xlu0 %v191_v17  ;;  %v1640_v17 = vunpack.c.l.bf16 %v1343_v9 }
  0x31   :  { %255 = vadd.xlane.f32.xlu2 %v239_v18  ;;  %v1642_v18 = vunpack.c.l.bf16 %v1342_v10  ;;  %v206_v50 = vmul.f32 %v1640_v17, %v1640_v17 }
  0x33   :  { %v205_v42 = vmul.f32 %v1642_v18, %v1642_v18 }
  0x37   :  { %131 = vadd.xlane.f32.xlu1 %v1558_v21  ;;  %257 = vadd.xlane.f32.xlu0 %v240_v22 }
  0x39   :  { %133 = vadd.xlane.f32.xlu2 %v1562_v23 }
  0x3f   :  { %165 = vadd.xlane.f32.xlu1 %v1566_v24  ;;  %163 = vadd.xlane.f32.xlu0 %v1568_v25 }
  0x41   :  { %227 = vadd.xlane.f32.xlu2 %v201_v26 }
  0x47   :  { %275 = vadd.xlane.f32.xlu1 %v249_v27  ;;  %229 = vadd.xlane.f32.xlu0 %v202_v28  ;;  %v1644_v28 = vunpack.c.h.bf16 %v1342_v10 }
  0x49   :  { %277 = vadd.xlane.f32.xlu2 %v250_v29  ;;  %v1212_v29 = vld [vmem:[#allocation6 + $0x18] sm:$0xff] }
  0x4a   :  { %1355 = vmatpush.bf16.msra.mxu2 %v1212_v29  ;;  %919 = vmatpush.bf16.msra.mxu0 %v1212_v29 }
  0x4f   :  { %117 = vadd.xlane.f32.xlu1 %v1580_v32  ;;  %115 = vadd.xlane.f32.xlu0 %v1582_v33 }
  0x51   :  { %147 = vadd.xlane.f32.xlu2 %v1584_v34 }
  0x57   :  { %211 = vadd.xlane.f32.xlu1 %v193_v35  ;;  %149 = vadd.xlane.f32.xlu0 %v1591_v36 }
  0x59   :  { %213 = vadd.xlane.f32.xlu2 %v194_v37 }
  0x5f   :  { %261 = vadd.xlane.f32.xlu1 %v242_v39  ;;  %259 = vadd.xlane.f32.xlu0 %v241_v40 }
  0x61   :  { %135 = vadd.xlane.f32.xlu2 %v1600_v41 }
  0x67   :  { %167 = vadd.xlane.f32.xlu1 %v1603_v43  ;;  %137 = vadd.xlane.f32.xlu0 %v1605_v44 }
  0x69   :  { %169 = vadd.xlane.f32.xlu2 %v1607_v45 }
  0x6f   :  { %233 = vadd.xlane.f32.xlu1 %v204_v46  ;;  %231 = vadd.xlane.f32.xlu0 %v203_v47  ;;  %v1655_v46 = vunpack.c.h.bf16 %v1343_v9  ;;  %v1211_v47 = vld [vmem:[#allocation6 + $0x10] sm:$0xff] }
  0x70   :  { %1356 = vmatpush.bf16.msra.mxu2 %v1211_v47  ;;  %920 = vmatpush.bf16.msra.mxu0 %v1211_v47 }
  0x71   :  { %279 = vadd.xlane.f32.xlu2 %v251_v48  ;;  %v1219_v48 = vld [vmem:[#allocation6 + $0x50] sm:$0xff]  ;;  %v254_v10 = vmul.f32 %v1655_v46, %v1655_v46 }
  0x72   :  { %1364 = vmatpush.bf16.msra.mxu3 %v1219_v48  ;;  %969 = vmatpush.bf16.msra.mxu1 %v1219_v48 }
  0x77   :  { %119 = vadd.xlane.f32.xlu1 %v1618_v51  ;;  %281 = vadd.xlane.f32.xlu0 %v252_v52 }
  0x79   :  { %121 = vadd.xlane.f32.xlu2 %v1622_v53 }
  0x7f   :  { %153 = vadd.xlane.f32.xlu1 %v1626_v54  ;;  %151 = vadd.xlane.f32.xlu0 %v1628_v55 }
  0x81   :  { %215 = vadd.xlane.f32.xlu2 %v195_v56 }
  0x82   :  { %v160_v59 = vpop.xlane.xlu1 %159  ;;  %v128_v60 = vpop.xlane.xlu0 %127 }
  0x83   :  { %v183_v26 = vadd.f32 %v160_v59, %v128_v60 }
  0x84   :  { %v224_v3 = vpop.xlane.xlu2 %223 }
  0x85   :  { %v1648_v31 = vmul.f32 0.00390625, %v183_v26 }
  0x87   :  { %263 = vadd.xlane.f32.xlu1 %v243_v61  ;;  %217 = vadd.xlane.f32.xlu0 %v196_v62  ;;  %v343_v57 = vmul.f32 %v1648_v31, %v1648_v31  ;;  %v1210_v61 = vld [vmem:[#allocation6 + $0x8] sm:$0xff] }
  0x88   :  { %v1218_v62 = vld [vmem:[#allocation6 + $0x48] sm:$0xff]  ;;  %1357 = vmatpush.bf16.msra.mxu2 %v1210_v61  ;;  %921 = vmatpush.bf16.msra.mxu0 %v1210_v61 }
  0x89   :  { %265 = vadd.xlane.f32.xlu2 %v244_v4  ;;  %1365 = vmatpush.bf16.msra.mxu3 %v1218_v62 }
  0x8a   :  { %v162_v12 = vpop.xlane.xlu1 %161  ;;  %v130_v16 = vpop.xlane.xlu0 %129  ;;  %970 = vmatpush.bf16.msra.mxu1 %v1218_v62 }
  0x8b   :  { %v184_v27 = vadd.f32 %v162_v12, %v130_v16  ;;  %v253_v12 = vmul.f32 %v1644_v28, %v1644_v28  ;;  %v1209_v16 = vld [vmem:[#allocation6] sm:$0xff] }
  0x8c   :  { %v226_v22 = vpop.xlane.xlu2 %225  ;;  %1358 = vmatpush.bf16.msra.mxu2 %v1209_v16  ;;  %922 = vmatpush.bf16.msra.mxu0 %v1209_v16 }
  0x8d   :  { %v1650_v35 = vmul.f32 0.00390625, %v184_v27  ;;  %1366 = vmatpush.bf16.msra.mxu3 %v1217_v19  ;;  %v1335_v27 = vld [vmem:[#allocation3 + $0x38] sm:$0xff]  }
  0x8e   :  { %971 = vmatpush.bf16.msra.mxu1 %v1217_v19 }
  0x8f   :  { %141 = vadd.xlane.f32.xlu1 %v1640_v17  ;;  %139 = vadd.xlane.f32.xlu0 %v1642_v18  ;;  %v344_v56 = vmul.f32 %v1650_v35, %v1650_v35  ;;  %v568_v62 = vsub.f32 %v1528_v5, %v1650_v35 }
  0x91   :  { %171 = vadd.xlane.f32.xlu2 %v1644_v28 }
  0x92   :  { %v274_v37 = vpop.xlane.xlu1 %273  ;;  %v272_v38 = vpop.xlane.xlu0 %271 }
  0x93   :  { %v296_v39 = vadd.f32 %v274_v37, %v226_v22  ;;  %v295_v40 = vadd.f32 %v272_v38, %v224_v3  ;;  %v1670_v22 = vunpack.c.l.bf16 %v1334_v7 }
  0x94   :  { %v112_v49 = vpop.xlane.xlu2 %111 }
  0x95   :  { %v328_v52 = vmul.f32 0.00390625, %v296_v39  ;;  %v327_v58 = vmul.f32 0.00390625, %v295_v40  ;;  %v1676_v39 = vunpack.c.h.bf16 %v1334_v7  ;;  %v1678_v40 = vunpack.c.l.bf16 %v1335_v27 }
  0x97   :  { %v360_v59 = vsub.f32 %v328_v52, %v344_v56  ;;  %v359_v60 = vsub.f32 %v327_v58, %v343_v57  ;;  %235 = vadd.xlane.f32.xlu1 %v205_v42  ;;  %173 = vadd.xlane.f32.xlu0 %v1655_v46  ;;  %v1681_v52 = vunpack.c.h.bf16 %v1335_v27  ;;  %v198_v16 = vmul.f32 %v1678_v40, %v1678_v40 }
  0x99   :  { %v376_v63 = vmax.f32 %v360_v59, 0.0  ;;  %v375_v0 = vmax.f32 %v359_v60, 0.0  ;;  %237 = vadd.xlane.f32.xlu2 %v206_v50 }
  0x9a   :  { %v114_v3 = vpop.xlane.xlu0 %113  ;;  %v144_v4 = vpop.xlane.xlu1 %143 }
  0x9b   :  { %v392_v8 = vadd.f32 1e-05, %v376_v63  ;;  %v1664_v9 = vadd.f32 1e-05, %v375_v0  ;;  %v175_v26 = vadd.f32 %v144_v4, %v112_v49 }
  0x9c   :  { %v146_v20 = vpop.xlane.xlu2 %145 }
  0x9d   :  { %1373 = vrsqrt.f32 %v392_v8  ;;  %v1674_v38 = vmul.f32 0.00390625, %v175_v26  ;;  %v176_v57 = vadd.f32 %v146_v20, %v114_v3  ;;  %v197_v3 = vmul.f32 %v1670_v22, %v1670_v22 }
  0x9e   :  { %1375 = vrsqrt.f32 %v1664_v9  ;;  %v616_v26 = vsub.f32 %v1530_v6, %v1650_v35  ;;  %vm495_vm2 = vweird.f32 %v392_v8  ;;  %vm485_vm4 = vweird.f32 %v1664_v9 }
  0x9f   :  { %285 = vadd.xlane.f32.xlu1 %v254_v10  ;;  %283 = vadd.xlane.f32.xlu0 %v253_v12  ;;  %v335_v59 = vmul.f32 %v1674_v38, %v1674_v38  ;;  %v1692_v7 = vmul.f32 0.00390625, %v176_v57 }
  0xa1   :  { %123 = vadd.xlane.f32.xlu2 %v1670_v22  ;;  %v336_v6 = vmul.f32 %v1692_v7, %v1692_v7 }
  0xa2   :  { %v210_v29 = vpop.xlane.xlu1 %209  ;;  %v208_v30 = vpop.xlane.xlu0 %207 }
  0xa3   :  { %v1374_v37 = vpop.eup %1373 }
  0xa4   :  { %v1376_v42 = vpop.eup %1375  ;;  %v490_v47 = vmul.f32 %v1374_v37, %v392_v8  ;;  %v256_v48 = vpop.xlane.xlu2 %255  ;;  %vm496_vm0 = vweird.f32 %v1374_v37 }
  0xa5   :  { %v480_v49 = vmul.f32 %v1376_v42, %v1664_v9  ;;  %v287_v50 = vadd.f32 %v256_v48, %v208_v30  ;;  %vm486_vm1 = vweird.f32 %v1376_v42  ;;  %vm497_vm3 = vmor %vm495_vm2, %vm496_vm0 }
  0xa6   :  { %v491_v56 = vmul.f32 %v1374_v37, %v490_v47  ;;  %v245_v47 = vmul.f32 %v1676_v39, %v1676_v39  ;;  %vm487_vm5 = vmor %vm485_vm4, %vm486_vm1 }
  0xa7   :  { %v481_v58 = vmul.f32 %v1376_v42, %v480_v49  ;;  %v319_v60 = vmul.f32 0.00390625, %v287_v50  ;;  %155 = vadd.xlane.f32.xlu1 %v1676_v39  ;;  %125 = vadd.xlane.f32.xlu0 %v1678_v40 }
  0xa8   :  { %v492_v61 = vmul.f32 0.5, %v491_v56  ;;  %v567_v56 = vsub.f32 %v1522_v2, %v1648_v31 }
  0xa9   :  { %v482_v63 = vmul.f32 0.5, %v481_v58  ;;  %v351_v0 = vsub.f32 %v319_v60, %v335_v59  ;;  %157 = vadd.xlane.f32.xlu2 %v1681_v52 }
  0xaa   :  { %v493_v4 = vsub.f32 1.5, %v492_v61  ;;  %v132_v10 = vpop.xlane.xlu1 %131  ;;  %v258_v12 = vpop.xlane.xlu0 %257 }
  0xab   :  { %v483_v19 = vsub.f32 1.5, %v482_v63  ;;  %v367_v20 = vmax.f32 %v351_v0, 0.0  ;;  %v288_v5 = vadd.f32 %v258_v12, %v210_v29  ;;  %v615_v29 = vsub.f32 %v1520_v1, %v1648_v31 }
  0xac   :  { %v494_v27 = vmul.f32 %v1374_v37, %v493_v4  ;;  %v134_v30 = vpop.xlane.xlu2 %133 }
  0xad   :  { %v484_v48 = vmul.f32 %v1376_v42, %v483_v19  ;;  %v383_v49 = vadd.f32 1e-05, %v367_v20  ;;  %v320_v50 = vmul.f32 0.00390625, %v288_v5 }
  0xae   :  { %v498_v57 = vsel %vm497_vm3, %v1374_v37, %v494_v27 }
  0xaf   :  { %v584_v35 = vmul.f32 %v568_v62, %v498_v57  ;;  %v632_v8 = vmul.f32 %v616_v26, %v498_v57  ;;  %v488_v58 = vsel %vm487_vm5, %v1376_v42, %v484_v48  ;;  %1377 = vrsqrt.f32 %v383_v49  ;;  %219 = vadd.xlane.f32.xlu0 %v197_v3  ;;  %221 = vadd.xlane.f32.xlu1 %v198_v16 }
  0xb0   :  { %v583_v9 = vmul.f32 %v567_v56, %v488_v58  ;;  %v631_v59 = vmul.f32 %v615_v29, %v488_v58  ;;  %v352_v60 = vsub.f32 %v320_v50, %v336_v6  ;;  %v246_v62 = vmul.f32 %v1681_v52, %v1681_v52 }
  0xb1   :  { %v600_v61 = vpack.c.bf16 %v584_v35, %v584_v35  ;;  %v648_v2 = vpack.c.bf16 %v632_v8, %v632_v8  ;;  %267 = vadd.xlane.f32.xlu2 %v245_v47  ;;  %v559_v57 = vsub.f32 %v1540_v11, %v1674_v38  ;;  %vm405_vm7 = vweird.f32 %v383_v49 }
  0xb2   :  { %v599_v63 = vpack.c.bf16 %v583_v9, %v583_v9  ;;  %v647_v1 = vpack.c.bf16 %v631_v59, %v631_v59  ;;  %v368_v31 = vmax.f32 %v352_v60, 0.0  ;;  %v166_v37 = vpop.xlane.xlu1 %165  ;;  %v164_v0 = vpop.xlane.xlu0 %163  ;;  %v607_v11 = vsub.f32 %v1545_v14, %v1674_v38 }
  0xb3   :  { %664 = vst [vmem:[#allocation2 + $0x48] sm:$0xf] %v600_v61  ;;  %v185_v12 = vadd.f32 %v164_v0, %v132_v10  ;;  %v186_v20 = vadd.f32 %v166_v37, %v134_v30 }
  0xb4   :  { %680 = vst [vmem:[#allocation2 + $0x4c] sm:$0xf] %v648_v2  ;;  %v1710_v42 = vadd.f32 1e-05, %v368_v31  ;;  %v228_v3 = vpop.xlane.xlu2 %227 }
  0xb5   :  { %v1378_v4 = vpop.eup %1377  ;;  %663 = vst [vmem:[#allocation2 + $0x40] sm:$0xf] %v599_v63  ;;  %v1713_v5 = vmul.f32 0.00390625, %v185_v12  ;;  %v1717_v6 = vmul.f32 0.00390625, %v186_v20 }
  0xb6   :  { %679 = vst [vmem:[#allocation2 + $0x44] sm:$0xf] %v647_v1  ;;  %v400_v16 = vmul.f32 %v1378_v4, %v383_v49  ;;  %1379 = vrsqrt.f32 %v1710_v42  ;;  %vm406_vm6 = vweird.f32 %v1378_v4  ;;  %vm415_vm10 = vweird.f32 %v1710_v42 }
  0xb7   :  { %269 = vadd.xlane.f32.xlu0 %v246_v62  ;;  %v345_v9 = vmul.f32 %v1713_v5, %v1713_v5  ;;  %vm407_vm8 = vmor %vm405_vm7, %vm406_vm6  ;;  %v346_v62 = vmul.f32 %v1717_v6, %v1717_v6 }
  0xb8   :  { %v401_v19 = vmul.f32 %v1378_v4, %v400_v16 }
  0xba   :  { %v402_v26 = vmul.f32 0.5, %v401_v19  ;;  %v276_v27 = vpop.xlane.xlu1 %275  ;;  %v230_v47 = vpop.xlane.xlu0 %229  ;;  %v1202_v50 = vld [vmem:[#allocation2 + $0x44] sm:$0xf0] }
  0xbb   :  { %v297_v48 = vadd.f32 %v276_v27, %v228_v3  ;;  %v1101_v56 = vld [vmem:[#allocation2 + $0x48] sm:$0xf0] }
  0xbc   :  { %v1380_v29 = vpop.eup %1379  ;;  %v403_v10 = vsub.f32 1.5, %v402_v26  ;;  %v278_v35 = vpop.xlane.xlu2 %277  ;;  %v1099_v8 = vld [vmem:[#allocation2 + $0x40] sm:$0xf] }
  0xbd   :  { %v410_v30 = vmul.f32 %v1380_v29, %v1710_v42  ;;  %v329_v58 = vmul.f32 0.00390625, %v297_v48  ;;  %v298_v59 = vadd.f32 %v278_v35, %v230_v47  ;;  %v1201_v60 = vld [vmem:[#allocation2 + $0x44] sm:$0xf]  ;;  %v1100_v2 = vor.u32 %v1202_v50, %v1099_v8 }
  0xbe   :  { %v404_v61 = vmul.f32 %v1378_v4, %v403_v10  ;;  %v1104_v63 = vor.u32 %v1201_v60, %v1101_v56  ;;  %vm416_vm9 = vweird.f32 %v1380_v29  ;;  %v560_v56 = vsub.f32 %v1543_v13, %v1692_v7 }
  0xbf   :  { %v411_v1 = vmul.f32 %v1380_v29, %v410_v30  ;;  %v361_v31 = vsub.f32 %v329_v58, %v345_v9  ;;  %v330_v37 = vmul.f32 0.00390625, %v298_v59  ;;  %943 = vmatmul.bf16.vlgmr.msra.gmra.mxu2 %v1100_v2  ;;  %vm417_vm11 = vmor %vm415_vm10, %vm416_vm9 }
  0xc0   :  { %v408_v0 = vsel %vm407_vm8, %v1378_v4, %v404_v61  ;;  %992 = vmatmul.bf16.vlgmr.msra.gmra.mxu3 %v1104_v63 }
  0xc1   :  { %v575_v3 = vmul.f32 %v559_v57, %v408_v0  ;;  %v623_v12 = vmul.f32 %v607_v11, %v408_v0  ;;  %v412_v16 = vmul.f32 0.5, %v411_v1  ;;  %v377_v19 = vmax.f32 %v361_v31, 0.0 }
  0xc2   :  { %v362_v49 = vsub.f32 %v330_v37, %v346_v62  ;;  %v118_v20 = vpop.xlane.xlu1 %117  ;;  %v116_v26 = vpop.xlane.xlu0 %115  ;;  %v608_v57 = vsub.f32 %v1547_v15, %v1692_v7  ;;  %v617_v0 = vsub.f32 %v1568_v25, %v1713_v5 }
  0xc3   :  { %v591_v27 = vpack.c.bf16 %v575_v3, %v575_v3  ;;  %v639_v14 = vpack.c.bf16 %v623_v12, %v623_v12  ;;  %v413_v38 = vsub.f32 1.5, %v412_v16  ;;  %v393_v47 = vadd.f32 1e-05, %v377_v19 }
  0xc4   :  { %v378_v48 = vmax.f32 %v362_v49, 0.0  ;;  %v148_v50 = vpop.xlane.xlu2 %147 }
  0xc5   :  { %655 = vst [vmem:[#allocation2] sm:$0xf] %v591_v27  ;;  %v414_v4 = vmul.f32 %v1380_v29, %v413_v38  ;;  %1381 = vrsqrt.f32 %v393_v47  ;;  %v177_v7 = vadd.f32 %v148_v50, %v116_v26  ;;  %vm505_vm13 = vweird.f32 %v393_v47 }
  0xc6   :  { %671 = vst [vmem:[#allocation2 + $0x4] sm:$0xf] %v639_v14  ;;  %v394_v10 = vadd.f32 1e-05, %v378_v48 }
  0xc7   :  { %v418_v35 = vsel %vm417_vm11, %v1380_v29, %v414_v4  ;;  %v569_v29 = vsub.f32 %v1558_v21, %v1713_v5  ;;  %v1738_v3 = vmul.f32 0.00390625, %v177_v7 }
  0xc8   :  { %v576_v8 = vmul.f32 %v560_v56, %v418_v35  ;;  %v624_v30 = vmul.f32 %v608_v57, %v418_v35  ;;  %1383 = vrsqrt.f32 %v394_v10  ;;  %vm515_vm0 = vweird.f32 %v394_v10 }
  0xc9   :  { %v337_v35 = vmul.f32 %v1738_v3, %v1738_v3 }
  0xca   :  { %v592_v58 = vpack.c.bf16 %v576_v8, %v576_v8  ;;  %v640_v9 = vpack.c.bf16 %v624_v30, %v624_v30  ;;  %v212_v59 = vpop.xlane.xlu1 %211  ;;  %v150_v60 = vpop.xlane.xlu0 %149 }
  0xcb   :  { %v1382_v42 = vpop.eup %1381  ;;  %v178_v2 = vadd.f32 %v150_v60, %v118_v20  ;;  %v618_v60 = vsub.f32 %v1566_v24, %v1717_v6 }
  0xcc   :  { %656 = vst [vmem:[#allocation2 + $0x8] sm:$0xf] %v592_v58  ;;  %v500_v61 = vmul.f32 %v1382_v42, %v393_v47  ;;  %v214_v13 = vpop.xlane.xlu2 %213  ;;  %vm506_vm12 = vweird.f32 %v1382_v42  ;;  %v1067_v26 = vld [vmem:[#allocation2] sm:$0xf] }
  0xcd   :  { %672 = vst [vmem:[#allocation2 + $0xc] sm:$0xf] %v640_v9  ;;  %v1732_v31 = vmul.f32 0.00390625, %v178_v2  ;;  %v1193_v25 = vld [vmem:[#allocation2 + $0x4] sm:$0xf]  ;;  %vm507_vm15 = vmor %vm505_vm13, %vm506_vm12 }
  0xce   :  { %v1384_v63 = vpop.eup %1383  ;;  %v501_v15 = vmul.f32 %v1382_v42, %v500_v61 }
  0xcf   :  { %v510_v11 = vmul.f32 %v1384_v63, %v394_v10  ;;  %vm516_vm14 = vweird.f32 %v1384_v63  ;;  %v338_v21 = vmul.f32 %v1732_v31, %v1732_v31 }
  0xd0   :  { %v502_v1 = vmul.f32 0.5, %v501_v15  ;;  %vm517_vm1 = vmor %vm515_vm0, %vm516_vm14 }
  0xd1   :  { %v511_v37 = vmul.f32 %v1384_v63, %v510_v11 }
  0xd2   :  { %v503_v62 = vsub.f32 1.5, %v502_v1  ;;  %v262_v12 = vpop.xlane.xlu1 %261  ;;  %v260_v16 = vpop.xlane.xlu0 %259 }
  0xd3   :  { %v512_v19 = vmul.f32 0.5, %v511_v37  ;;  %v290_v49 = vadd.f32 %v262_v12, %v214_v13  ;;  %v289_v20 = vadd.f32 %v260_v16, %v212_v59  ;;  %v1194_v27 = vld [vmem:[#allocation2 + $0x4] sm:$0xf0]  ;;  %v570_v59 = vsub.f32 %v1562_v23, %v1717_v6 }
  0xd4   :  { %v504_v14 = vmul.f32 %v1382_v42, %v503_v62  ;;  %v136_v38 = vpop.xlane.xlu2 %135  ;;  %v1068_v48 = vor.u32 %v1194_v27, %v1067_v26  ;;  %v1069_v5 = vld [vmem:[#allocation2 + $0x8] sm:$0xf0] }
  0xd5   :  { %v513_v50 = vsub.f32 1.5, %v512_v19  ;;  %v322_v4 = vmul.f32 0.00390625, %v290_v49  ;;  %v321_v56 = vmul.f32 0.00390625, %v289_v20  ;;  %v1072_v47 = vor.u32 %v1193_v25, %v1069_v5 }
  0xd6   :  { %v508_v57 = vsel %vm507_vm15, %v1382_v42, %v504_v14  ;;  %923 = vmatmul.bf16.vlgmr.msra.gmra.mxu0 %v1068_v48 }
  0xd7   :  { %v585_v8 = vmul.f32 %v569_v29, %v508_v57  ;;  %v633_v30 = vmul.f32 %v617_v0, %v508_v57  ;;  %v514_v58 = vmul.f32 %v1384_v63, %v513_v50  ;;  %v354_v9 = vsub.f32 %v322_v4, %v338_v21  ;;  %972 = vmatmul.bf16.vlgmr.msra.gmra.mxu1 %v1072_v47 }
  0xd8   :  { %v353_v61 = vsub.f32 %v321_v56, %v337_v35 }
  0xd9   :  { %v601_v42 = vpack.c.bf16 %v585_v8, %v585_v8  ;;  %v649_v10 = vpack.c.bf16 %v633_v30, %v633_v30  ;;  %v518_v2 = vsel %vm517_vm1, %v1384_v63, %v514_v58  ;;  %v370_v13 = vmax.f32 %v354_v9, 0.0 }
  0xda   :  { %v586_v15 = vmul.f32 %v570_v59, %v518_v2  ;;  %v634_v7 = vmul.f32 %v618_v60, %v518_v2  ;;  %v369_v11 = vmax.f32 %v353_v61, 0.0  ;;  %v168_v1 = vpop.xlane.xlu1 %167  ;;  %v138_v29 = vpop.xlane.xlu0 %137 }
  0xdb   :  { %665 = vst [vmem:[#allocation2 + $0x50] sm:$0xf] %v601_v42  ;;  %v386_v37 = vadd.f32 1e-05, %v370_v13  ;;  %v187_v24 = vadd.f32 %v168_v1, %v136_v38  ;;  %v562_v13 = vsub.f32 %v1580_v32, %v1732_v31 }
  0xdc   :  { %681 = vst [vmem:[#allocation2 + $0x54] sm:$0xf] %v649_v10  ;;  %v602_v0 = vpack.c.bf16 %v586_v15, %v586_v15  ;;  %v650_v23 = vpack.c.bf16 %v634_v7, %v634_v7  ;;  %v385_v62 = vadd.f32 1e-05, %v369_v11  ;;  %v170_v12 = vpop.xlane.xlu2 %169  ;;  %v610_v15 = vsub.f32 %v1591_v36, %v1732_v31 }
  0xdd   :  { %1385 = vrsqrt.f32 %v386_v37  ;;  %v1750_v19 = vmul.f32 0.00390625, %v187_v24  ;;  %v188_v5 = vadd.f32 %v170_v12, %v138_v29  ;;  %vm435_vm4 = vweird.f32 %v386_v37 }
  0xde   :  { %666 = vst [vmem:[#allocation2 + $0x58] sm:$0xf] %v602_v0  ;;  %1387 = vrsqrt.f32 %v385_v62  ;;  %vm425_vm6 = vweird.f32 %v385_v62  ;;  %v609_v12 = vsub.f32 %v1584_v34, %v1738_v3 }
  0xdf   :  { %682 = vst [vmem:[#allocation2 + $0x5c] sm:$0xf] %v650_v23  ;;  %v347_v38 = vmul.f32 %v1750_v19, %v1750_v19  ;;  %v1754_v59 = vmul.f32 0.00390625, %v188_v5  ;;  %v561_v23 = vsub.f32 %v1582_v33, %v1738_v3 }
  0xe1   :  { %v348_v32 = vmul.f32 %v1754_v59, %v1754_v59 }
  0xe2   :  { %v234_v6 = vpop.xlane.xlu1 %233  ;;  %v232_v63 = vpop.xlane.xlu0 %231  ;;  %v1107_v21 = vld [vmem:[#allocation2 + $0x50] sm:$0xf] }
  0xe3   :  { %v1386_v16 = vpop.eup %1385  ;;  %v1203_v4 = vld [vmem:[#allocation2 + $0x54] sm:$0xf] }
  0xe4   :  { %v1388_v49 = vpop.eup %1387  ;;  %v430_v20 = vmul.f32 %v1386_v16, %v386_v37  ;;  %v280_v26 = vpop.xlane.xlu2 %279  ;;  %vm436_vm2 = vweird.f32 %v1386_v16 }
  0xe5   :  { %v420_v27 = vmul.f32 %v1388_v49, %v385_v62  ;;  %v299_v14 = vadd.f32 %v280_v26, %v232_v63  ;;  %v1204_v48 = vld [vmem:[#allocation2 + $0x54] sm:$0xf0]  ;;  %vm426_vm3 = vweird.f32 %v1388_v49  ;;  %vm437_vm5 = vmor %vm435_vm4, %vm436_vm2 }
  0xe6   :  { %v431_v25 = vmul.f32 %v1386_v16, %v430_v20  ;;  %v1108_v50 = vor.u32 %v1204_v48, %v1107_v21  ;;  %v1109_v56 = vld [vmem:[#allocation2 + $0x58] sm:$0xf0]  ;;  %vm427_vm7 = vmor %vm425_vm6, %vm426_vm3 }
  0xe7   :  { %v421_v47 = vmul.f32 %v1388_v49, %v420_v27  ;;  %v331_v57 = vmul.f32 0.00390625, %v299_v14  ;;  %v1112_v35 = vor.u32 %v1203_v4, %v1109_v56 }
  0xe8   :  { %v432_v8 = vmul.f32 0.5, %v431_v25  ;;  %948 = vmatmul.bf16.gmra.mxu2 %v1108_v50 }
  0xe9   :  { %v422_v30 = vmul.f32 0.5, %v421_v47  ;;  %v363_v58 = vsub.f32 %v331_v57, %v347_v38  ;;  %997 = vmatmul.bf16.gmra.mxu3 %v1112_v35 }
  0xea   :  { %v433_v9 = vsub.f32 1.5, %v432_v8  ;;  %v120_v60 = vpop.xlane.xlu1 %119  ;;  %v282_v61 = vpop.xlane.xlu0 %281 }
  0xeb   :  { %v423_v42 = vsub.f32 1.5, %v422_v30  ;;  %v379_v10 = vmax.f32 %v363_v58, 0.0  ;;  %v300_v2 = vadd.f32 %v282_v61, %v234_v6  ;;  %v571_v58 = vsub.f32 %v1600_v41, %v1750_v19 }
  0xec   :  { %v434_v7 = vmul.f32 %v1386_v16, %v433_v9  ;;  %v122_v11 = vpop.xlane.xlu2 %121  ;;  %v619_v41 = vsub.f32 %v1603_v43, %v1750_v19 }
  0xed   :  { %v424_v1 = vmul.f32 %v1388_v49, %v423_v42  ;;  %v395_v29 = vadd.f32 1e-05, %v379_v10  ;;  %v332_v0 = vmul.f32 0.00390625, %v300_v2 }
  0xee   :  { %v438_v24 = vsel %vm437_vm5, %v1386_v16, %v434_v7 }
  0xef   :  { %v578_v36 = vmul.f32 %v562_v13, %v438_v24  ;;  %v626_v31 = vmul.f32 %v610_v15, %v438_v24  ;;  %v428_v37 = vsel %vm427_vm7, %v1388_v49, %v424_v1  ;;  %1389 = vrsqrt.f32 %v395_v29 }
  0xf0   :  { %v577_v6 = vmul.f32 %v561_v23, %v428_v37  ;;  %v625_v62 = vmul.f32 %v609_v12, %v428_v37  ;;  %v364_v63 = vsub.f32 %v332_v0, %v348_v32  ;;  %vm525_vm9 = vweird.f32 %v395_v29 }
  0xf1   :  { %v594_v20 = vpack.c.bf16 %v578_v36, %v578_v36  ;;  %v642_v26 = vpack.c.bf16 %v626_v31, %v626_v31 }
  0xf2   :  { %v593_v27 = vpack.c.bf16 %v577_v6, %v577_v6  ;;  %v641_v33 = vpack.c.bf16 %v625_v62, %v625_v62  ;;  %v380_v14 = vmax.f32 %v364_v63, 0.0  ;;  %v154_v21 = vpop.xlane.xlu1 %153  ;;  %v152_v34 = vpop.xlane.xlu0 %151 }
  0xf3   :  { %658 = vst [vmem:[#allocation2 + $0x18] sm:$0xf] %v594_v20  ;;  %v179_v25 = vadd.f32 %v152_v34, %v120_v60  ;;  %v180_v50 = vadd.f32 %v154_v21, %v122_v11  ;;  %v572_v34 = vsub.f32 %v1605_v44, %v1754_v59 }
  0xf4   :  { %674 = vst [vmem:[#allocation2 + $0x1c] sm:$0xf] %v642_v26  ;;  %v1767_v3 = vadd.f32 1e-05, %v380_v14  ;;  %v216_v16 = vpop.xlane.xlu2 %215 }
  0xf5   :  { %v1390_v48 = vpop.eup %1389  ;;  %657 = vst [vmem:[#allocation2 + $0x10] sm:$0xf] %v593_v27  ;;  %v1770_v4 = vmul.f32 0.00390625, %v179_v25  ;;  %v1774_v60 = vmul.f32 0.00390625, %v180_v50 }
  0xf6   :  { %673 = vst [vmem:[#allocation2 + $0x14] sm:$0xf] %v641_v33  ;;  %v520_v49 = vmul.f32 %v1390_v48, %v395_v29  ;;  %1391 = vrsqrt.f32 %v1767_v3  ;;  %vm526_vm8 = vweird.f32 %v1390_v48  ;;  %vm535_vm12 = vweird.f32 %v1767_v3 }
  0xf7   :  { %v339_v13 = vmul.f32 %v1770_v4, %v1770_v4  ;;  %vm527_vm10 = vmor %vm525_vm9, %vm526_vm8  ;;  %v340_v36 = vmul.f32 %v1774_v60, %v1774_v60 }
  0xf8   :  { %v521_v5 = vmul.f32 %v1390_v48, %v520_v49 }
  0xfa   :  { %v522_v56 = vmul.f32 0.5, %v521_v5  ;;  %v264_v47 = vpop.xlane.xlu1 %263  ;;  %v218_v38 = vpop.xlane.xlu0 %217  ;;  %v1196_v35 = vld [vmem:[#allocation2 + $0x14] sm:$0xf0] }
  0xfb   :  { %v291_v57 = vadd.f32 %v264_v47, %v216_v16  ;;  %v1077_v8 = vld [vmem:[#allocation2 + $0x18] sm:$0xf0]  ;;  %v620_v16 = vsub.f32 %v1607_v45, %v1754_v59 }
  0xfc   :  { %v1392_v30 = vpop.eup %1391  ;;  %v523_v9 = vsub.f32 1.5, %v522_v56  ;;  %v266_v61 = vpop.xlane.xlu2 %265  ;;  %v1075_v42 = vld [vmem:[#allocation2 + $0x10] sm:$0xf] }
  0xfd   :  { %v530_v10 = vmul.f32 %v1392_v30, %v1767_v3  ;;  %v323_v2 = vmul.f32 0.00390625, %v291_v57  ;;  %v292_v15 = vadd.f32 %v266_v61, %v218_v38  ;;  %v1195_v7 = vld [vmem:[#allocation2 + $0x14] sm:$0xf]  ;;  %v1076_v1 = vor.u32 %v1196_v35, %v1075_v42 }
  0xfe   :  { %v524_v11 = vmul.f32 %v1390_v48, %v523_v9  ;;  %v1080_v0 = vor.u32 %v1195_v7, %v1077_v8  ;;  %vm536_vm11 = vweird.f32 %v1392_v30 }
  0xff   :  { %v531_v23 = vmul.f32 %v1392_v30, %v530_v10  ;;  %v355_v12 = vsub.f32 %v323_v2, %v339_v13  ;;  %v324_v24 = vmul.f32 0.00390625, %v292_v15  ;;  %928 = vmatmul.bf16.gmra.mxu0 %v1076_v1  ;;  %vm537_vm13 = vmor %vm535_vm12, %vm536_vm11  ;;  %v611_v10 = vsub.f32 %v1628_v55, %v1770_v4 }
 0x100   :  { %v528_v32 = vsel %vm527_vm10, %v1390_v48, %v524_v11  ;;  %977 = vmatmul.bf16.gmra.mxu1 %v1080_v0 }
 0x101   :  { %v587_v31 = vmul.f32 %v571_v58, %v528_v32  ;;  %v635_v37 = vmul.f32 %v619_v41, %v528_v32  ;;  %v532_v6 = vmul.f32 0.5, %v531_v23  ;;  %v371_v62 = vmax.f32 %v355_v12, 0.0 }
 0x102   :  { %v356_v29 = vsub.f32 %v324_v24, %v340_v36  ;;  %v142_v63 = vpop.xlane.xlu1 %141  ;;  %v140_v20 = vpop.xlane.xlu0 %139 }
 0x103   :  { %v603_v26 = vpack.c.bf16 %v587_v31, %v587_v31  ;;  %v651_v43 = vpack.c.bf16 %v635_v37, %v635_v37  ;;  %v533_v19 = vsub.f32 1.5, %v532_v6  ;;  %v387_v27 = vadd.f32 1e-05, %v371_v62 }
 0x104   :  { %v372_v33 = vmax.f32 %v356_v29, 0.0  ;;  %v172_v14 = vpop.xlane.xlu2 %171 }
 0x105   :  { %667 = vst [vmem:[#allocation2 + $0x60] sm:$0xf] %v603_v26  ;;  %v534_v21 = vmul.f32 %v1392_v30, %v533_v19  ;;  %1393 = vrsqrt.f32 %v387_v27  ;;  %v189_v59 = vadd.f32 %v172_v14, %v140_v20  ;;  %vm445_vm15 = vweird.f32 %v387_v27 }
 0x106   :  { %683 = vst [vmem:[#allocation2 + $0x64] sm:$0xf] %v651_v43  ;;  %v388_v48 = vadd.f32 1e-05, %v372_v33  ;;  %v564_v19 = vsub.f32 %v1622_v53, %v1774_v60 }
 0x107   :  { %v538_v25 = vsel %vm537_vm13, %v1392_v30, %v534_v21  ;;  %v563_v30 = vsub.f32 %v1618_v51, %v1770_v4  ;;  %v1795_v13 = vmul.f32 0.00390625, %v189_v59 }
 0x108   :  { %v588_v49 = vmul.f32 %v572_v34, %v538_v25  ;;  %v636_v5 = vmul.f32 %v620_v16, %v538_v25  ;;  %1395 = vrsqrt.f32 %v388_v48  ;;  %vm455_vm2 = vweird.f32 %v388_v48 }
 0x109   :  { %v349_v29 = vmul.f32 %v1795_v13, %v1795_v13 }
 0x10a   :  { %v604_v50 = vpack.c.bf16 %v588_v49, %v588_v49  ;;  %v652_v56 = vpack.c.bf16 %v636_v5, %v636_v5  ;;  %v236_v47 = vpop.xlane.xlu1 %235  ;;  %v174_v38 = vpop.xlane.xlu0 %173 }
 0x10b   :  { %v1394_v3 = vpop.eup %1393  ;;  %v190_v35 = vadd.f32 %v174_v38, %v142_v63 }
 0x10c   :  { %668 = vst [vmem:[#allocation2 + $0x68] sm:$0xf] %v604_v50  ;;  %v440_v57 = vmul.f32 %v1394_v3, %v387_v27  ;;  %v238_v44 = vpop.xlane.xlu2 %237  ;;  %vm446_vm14 = vweird.f32 %v1394_v3  ;;  %v1115_v41 = vld [vmem:[#allocation2 + $0x60] sm:$0xf]  ;;  %v612_v27 = vsub.f32 %v1626_v54, %v1774_v60 }
 0x10d   :  { %684 = vst [vmem:[#allocation2 + $0x6c] sm:$0xf] %v652_v56  ;;  %v1789_v61 = vmul.f32 0.00390625, %v190_v35  ;;  %v1205_v55 = vld [vmem:[#allocation2 + $0x64] sm:$0xf]  ;;  %vm447_vm1 = vmor %vm445_vm15, %vm446_vm14 }
 0x10e   :  { %v1396_v8 = vpop.eup %1395  ;;  %v441_v45 = vmul.f32 %v1394_v3, %v440_v57 }
 0x10f   :  { %v450_v58 = vmul.f32 %v1396_v8, %v388_v48  ;;  %vm456_vm0 = vweird.f32 %v1396_v8  ;;  %v350_v51 = vmul.f32 %v1789_v61, %v1789_v61 }
 0x110   :  { %v442_v9 = vmul.f32 0.5, %v441_v45  ;;  %vm457_vm3 = vmor %vm455_vm2, %vm456_vm0 }
 0x111   :  { %v451_v42 = vmul.f32 %v1396_v8, %v450_v58 }
 0x112   :  { %v443_v2 = vsub.f32 1.5, %v442_v9  ;;  %v286_v15 = vpop.xlane.xlu1 %285  ;;  %v284_v7 = vpop.xlane.xlu0 %283 }
 0x113   :  { %v452_v11 = vmul.f32 0.5, %v451_v42  ;;  %v302_v1 = vadd.f32 %v286_v15, %v238_v44  ;;  %v301_v0 = vadd.f32 %v284_v7, %v236_v47  ;;  %v1206_v23 = vld [vmem:[#allocation2 + $0x64] sm:$0xf0] }
 0x114   :  { %v444_v12 = vmul.f32 %v1394_v3, %v443_v2  ;;  %v124_v24 = vpop.xlane.xlu2 %123  ;;  %v1116_v32 = vor.u32 %v1206_v23, %v1115_v41  ;;  %v1117_v4 = vld [vmem:[#allocation2 + $0x68] sm:$0xf0] }
 0x115   :  { %v453_v36 = vsub.f32 1.5, %v452_v11  ;;  %v334_v31 = vmul.f32 0.00390625, %v302_v1  ;;  %v333_v37 = vmul.f32 0.00390625, %v301_v0  ;;  %v1120_v6 = vor.u32 %v1205_v55, %v1117_v4 }
 0x116   :  { %v448_v62 = vsel %vm447_vm1, %v1394_v3, %v444_v12  ;;  %953 = vmatmul.bf16.gmra.mxu2 %v1116_v32 }
 0x117   :  { %v579_v63 = vmul.f32 %v563_v30, %v448_v62  ;;  %v627_v20 = vmul.f32 %v611_v10, %v448_v62  ;;  %v454_v26 = vmul.f32 %v1396_v8, %v453_v36  ;;  %v366_v43 = vsub.f32 %v334_v31, %v350_v51  ;;  %1002 = vmatmul.bf16.gmra.mxu3 %v1120_v6 }
 0x118   :  { %v365_v33 = vsub.f32 %v333_v37, %v349_v29  ;;  %v574_v6 = vsub.f32 %v1640_v17, %v1789_v61  ;;  %v622_v62 = vsub.f32 %v1655_v46, %v1789_v61 }
 0x119   :  { %v595_v14 = vpack.c.bf16 %v579_v63, %v579_v63  ;;  %v643_v21 = vpack.c.bf16 %v627_v20, %v627_v20  ;;  %v458_v34 = vsel %vm457_vm3, %v1396_v8, %v454_v26  ;;  %v382_v16 = vmax.f32 %v366_v43, 0.0 }
 0x11a   :  { %v580_v48 = vmul.f32 %v564_v19, %v458_v34  ;;  %v628_v25 = vmul.f32 %v612_v27, %v458_v34  ;;  %v381_v49 = vmax.f32 %v365_v33, 0.0  ;;  %v126_v5 = vpop.xlane.xlu0 %125  ;;  %v156_v38 = vpop.xlane.xlu1 %155  ;;  %v573_v43 = vsub.f32 %v1642_v18, %v1795_v13 }
 0x11b   :  { %659 = vst [vmem:[#allocation2 + $0x20] sm:$0xf] %v595_v14  ;;  %v398_v50 = vadd.f32 1e-05, %v382_v16  ;;  %v181_v54 = vadd.f32 %v156_v38, %v124_v24  ;;  %v621_v19 = vsub.f32 %v1644_v28, %v1795_v13 }
 0x11c   :  { %675 = vst [vmem:[#allocation2 + $0x24] sm:$0xf] %v643_v21  ;;  %v596_v56 = vpack.c.bf16 %v580_v48, %v580_v48  ;;  %v644_v47 = vpack.c.bf16 %v628_v25, %v628_v25  ;;  %v397_v53 = vadd.f32 1e-05, %v381_v49  ;;  %v158_v3 = vpop.xlane.xlu2 %157 }
 0x11d   :  { %1397 = vrsqrt.f32 %v398_v50  ;;  %v1807_v35 = vmul.f32 0.00390625, %v181_v54  ;;  %v182_v10 = vadd.f32 %v158_v3, %v126_v5  ;;  %vm555_vm6 = vweird.f32 %v398_v50 }
 0x11e   :  { %660 = vst [vmem:[#allocation2 + $0x28] sm:$0xf] %v596_v56  ;;  %1399 = vrsqrt.f32 %v397_v53  ;;  %vm545_vm8 = vweird.f32 %v397_v53 }
 0x11f   :  { %676 = vst [vmem:[#allocation2 + $0x2c] sm:$0xf] %v644_v47  ;;  %v341_v1 = vmul.f32 %v1807_v35, %v1807_v35  ;;  %v1811_v55 = vmul.f32 0.00390625, %v182_v10 }
 0x121   :  { %v342_v17 = vmul.f32 %v1811_v55, %v1811_v55 }
 0x122   :  { %v220_v60 = vpop.xlane.xlu0 %219  ;;  %v1083_v9 = vld [vmem:[#allocation2 + $0x20] sm:$0xf]  ;;  %v222_v12 = vpop.xlane.xlu1 %221 }
 0x123   :  { %v1398_v57 = vpop.eup %1397  ;;  %v1197_v15 = vld [vmem:[#allocation2 + $0x24] sm:$0xf] }
 0x124   :  { %v1400_v44 = vpop.eup %1399  ;;  %v550_v8 = vmul.f32 %v1398_v57, %v398_v50  ;;  %v268_v45 = vpop.xlane.xlu2 %267  ;;  %vm556_vm4 = vweird.f32 %v1398_v57 }
 0x125   :  { %v540_v59 = vmul.f32 %v1400_v44, %v397_v53  ;;  %v293_v58 = vadd.f32 %v268_v45, %v220_v60  ;;  %v1198_v30 = vld [vmem:[#allocation2 + $0x24] sm:$0xf0]  ;;  %vm546_vm5 = vweird.f32 %v1400_v44  ;;  %vm557_vm7 = vmor %vm555_vm6, %vm556_vm4 }
 0x126   :  { %v551_v42 = vmul.f32 %v1398_v57, %v550_v8  ;;  %v1084_v2 = vor.u32 %v1198_v30, %v1083_v9  ;;  %v1085_v7 = vld [vmem:[#allocation2 + $0x28] sm:$0xf0]  ;;  %vm547_vm9 = vmor %vm545_vm8, %vm546_vm5 }
 0x127   :  { %v541_v11 = vmul.f32 %v1400_v44, %v540_v59  ;;  %v325_v0 = vmul.f32 0.00390625, %v293_v58  ;;  %v1088_v41 = vor.u32 %v1197_v15, %v1085_v7  ;;  %v565_v59 = vsub.f32 %v1670_v22, %v1807_v35 }
 0x128   :  { %v552_v23 = vmul.f32 0.5, %v551_v42  ;;  %933 = vmatmul.bf16.gmra.mxu0 %v1084_v2  ;;  %v613_v58 = vsub.f32 %v1676_v39, %v1807_v35  ;;  %v566_v22 = vsub.f32 %v1678_v40, %v1811_v55  ;;  %v614_v39 = vsub.f32 %v1681_v52, %v1811_v55  ;;  %v1835_v35 = vld [vmem:[%s1861_s2] ss:$0 sm:$0xff]  ;;  %s1487_s2 = smov [#allocation8]  }
 0x129   :  { %v542_v51 = vmul.f32 0.5, %v541_v11  ;;  %v357_v24 = vsub.f32 %v325_v0, %v341_v1  ;;  %982 = vmatmul.bf16.gmra.mxu1 %v1088_v41  ;;  %s1049_s24 = sshll.u32 %s1487_s2, 4  ;;  %s1050_s24 = int_to_ptr.vmem [resolvable:$true] %s1049_s24 }
 0x12a   :  { %v553_v32 = vsub.f32 1.5, %v552_v23  ;;  %v270_v4 = vpop.xlane.xlu0 %269 }
 0x12b   :  { %v543_v36 = vsub.f32 1.5, %v542_v51  ;;  %v373_v31 = vmax.f32 %v357_v24, 0.0  ;;  %v294_v37 = vadd.f32 %v270_v4, %v222_v12 }
 0x12c   :  { %v554_v29 = vmul.f32 %v1398_v57, %v553_v32 }
 0x12d   :  { %v544_v63 = vmul.f32 %v1400_v44, %v543_v36  ;;  %v389_v20 = vadd.f32 1e-05, %v373_v31  ;;  %v326_v26 = vmul.f32 0.00390625, %v294_v37 }
 0x12e   :  { %v558_v27 = vsel %vm557_vm7, %v1398_v57, %v554_v29 }
 0x12f   :  { %v590_v46 = vmul.f32 %v574_v6, %v558_v27  ;;  %v638_v61 = vmul.f32 %v622_v62, %v558_v27  ;;  %v548_v33 = vsel %vm547_vm9, %v1400_v44, %v544_v63  ;;  %1401 = vrsqrt.f32 %v389_v20 }
 0x130   :  { %v589_v14 = vmul.f32 %v573_v43, %v548_v33  ;;  %v637_v21 = vmul.f32 %v621_v19, %v548_v33  ;;  %v358_v34 = vsub.f32 %v326_v26, %v342_v17  ;;  %vm465_vm11 = vweird.f32 %v389_v20 }
 0x131   :  { %v606_v16 = vpack.c.bf16 %v590_v46, %v590_v46  ;;  %v654_v48 = vpack.c.bf16 %v638_v61, %v638_v61 }
 0x132   :  { %v605_v25 = vpack.c.bf16 %v589_v14, %v589_v14  ;;  %v653_v18 = vpack.c.bf16 %v637_v21, %v637_v21  ;;  %v374_v49 = vmax.f32 %v358_v34, 0.0 }
 0x133   :  { %670 = vst [vmem:[#allocation2 + $0x78] sm:$0xf] %v606_v16 }
 0x134   :  { %686 = vst [vmem:[#allocation2 + $0x7c] sm:$0xf] %v654_v48  ;;  %v390_v28 = vadd.f32 1e-05, %v374_v49 }
 0x135   :  { %v1402_v13 = vpop.eup %1401  ;;  %669 = vst [vmem:[#allocation2 + $0x70] sm:$0xf] %v605_v25 }
 0x136   :  { %685 = vst [vmem:[#allocation2 + $0x74] sm:$0xf] %v653_v18  ;;  %v460_v5 = vmul.f32 %v1402_v13, %v389_v20  ;;  %1403 = vrsqrt.f32 %v390_v28  ;;  %vm466_vm10 = vweird.f32 %v1402_v13  ;;  %vm475_vm14 = vweird.f32 %v390_v28 }
 0x137   :  { %vm467_vm12 = vmor %vm465_vm11, %vm466_vm10 }
 0x138   :  { %v461_v50 = vmul.f32 %v1402_v13, %v460_v5 }
 0x13a   :  { %v462_v56 = vmul.f32 0.5, %v461_v50  ;;  %v1208_v47 = vld [vmem:[#allocation2 + $0x74] sm:$0xf0] }
 0x13b   :  { %v1125_v53 = vld [vmem:[#allocation2 + $0x78] sm:$0xf0] }
 0x13c   :  { %v1404_v38 = vpop.eup %1403  ;;  %v463_v3 = vsub.f32 1.5, %v462_v56  ;;  %v1123_v54 = vld [vmem:[#allocation2 + $0x70] sm:$0xf] }
 0x13d   :  { %v470_v60 = vmul.f32 %v1404_v38, %v390_v28  ;;  %v1124_v57 = vor.u32 %v1208_v47, %v1123_v54  ;;  %v1207_v44 = vld [vmem:[#allocation2 + $0x74] sm:$0xf]  ;;  %vm476_vm13 = vweird.f32 %v1404_v38 }
 0x13e   :  { %v464_v8 = vmul.f32 %v1402_v13, %v463_v3  ;;  %v1128_v45 = vor.u32 %v1207_v44, %v1125_v53  ;;  %vm477_vm15 = vmor %vm475_vm14, %vm476_vm13 }
 0x13f   :  { %v471_v9 = vmul.f32 %v1404_v38, %v470_v60  ;;  %958 = vmatmul.bf16.gmra.mxu2 %v1124_v57 }
 0x140   :  { %v468_v30 = vsel %vm467_vm12, %v1402_v13, %v464_v8  ;;  %1007 = vmatmul.bf16.gmra.mxu3 %v1128_v45 }
 0x141   :  { %v581_v42 = vmul.f32 %v565_v59, %v468_v30  ;;  %v629_v10 = vmul.f32 %v613_v58, %v468_v30  ;;  %v472_v2 = vmul.f32 0.5, %v471_v9 }
 0x142   :  { %v944_v1 = vpop.f32.mrf.mxu2 }
 0x143   :  { %v597_v15 = vpack.c.bf16 %v581_v42, %v581_v42  ;;  %v645_v7 = vpack.c.bf16 %v629_v10, %v629_v10  ;;  %v473_v11 = vsub.f32 1.5, %v472_v2  ;;  %v993_v0 = vpop.f32.mrf.mxu3  ;;  %v945_v4 = vadd.f32 %v1835_v35, %v944_v1 }
 0x145   :  { %661 = vst [vmem:[#allocation2 + $0x30] sm:$0xf] %v597_v15  ;;  %v474_v41 = vmul.f32 %v1404_v38, %v473_v11  ;;  %v994_v55 = vadd.f32 %v993_v0, %v945_v4 }
 0x146   :  { %677 = vst [vmem:[#allocation2 + $0x34] sm:$0xf] %v645_v7 }
 0x147   :  { %v478_v23 = vsel %vm477_vm15, %v1404_v38, %v474_v41 }
 0x148   :  { %v582_v12 = vmul.f32 %v566_v22, %v478_v23  ;;  %v630_v51 = vmul.f32 %v614_v39, %v478_v23 }
 0x14a   :  { %v598_v24 = vpack.c.bf16 %v582_v12, %v582_v12  ;;  %v646_v32 = vpack.c.bf16 %v630_v51, %v630_v51  ;;  %v946_v36 = vpop.f32.mrf.mxu2 }
 0x14b   :  { %v947_v40 = vadd.f32 %v1835_v35, %v946_v36  ;;  %v995_v52 = vpop.f32.mrf.mxu3 }
 0x14c   :  { %662 = vst [vmem:[#allocation2 + $0x38] sm:$0xf] %v598_v24  ;;  %v1091_v62 = vld [vmem:[#allocation2 + $0x30] sm:$0xf] }
 0x14d   :  { %678 = vst [vmem:[#allocation2 + $0x3c] sm:$0xf] %v646_v32  ;;  %v996_v31 = vadd.f32 %v995_v52, %v947_v40  ;;  %v1199_v26 = vld [vmem:[#allocation2 + $0x34] sm:$0xf] }
 0x14f   :  { %v1312_v37 = vpack.c.bf16 %v996_v31, %v994_v55 }
 0x151   :  { %1347 = vst [vmem:[#allocation8 + $0x20] sm:$0xff] %v1312_v37  }
 0x153   :  { %v924_v6 = vpop.f32.mrf.mxu0  ;;  %v1200_v29 = vld [vmem:[#allocation2 + $0x34] sm:$0xf0] }
 0x154   :  { %v973_v63 = vpop.f32.mrf.mxu1  ;;  %v1092_v20 = vor.u32 %v1200_v29, %v1091_v62  ;;  %v1093_v43 = vld [vmem:[#allocation2 + $0x38] sm:$0xf0]  ;;  %v925_v27 = vadd.f32 %v1835_v35, %v924_v6 }
 0x155   :  { %v1096_v19 = vor.u32 %v1199_v26, %v1093_v43 }
 0x156   :  { %938 = vmatmul.bf16.gmra.mxu0 %v1092_v20  ;;  %v974_v33 = vadd.f32 %v973_v63, %v925_v27 }
 0x157   :  { %987 = vmatmul.bf16.gmra.mxu1 %v1096_v19 }
 0x15b   :  { %v926_v17 = vpop.f32.mrf.mxu0 }
 0x15c   :  { %v927_v46 = vadd.f32 %v1835_v35, %v926_v17  ;;  %v975_v61 = vpop.f32.mrf.mxu1 }
 0x15e   :  { %v976_v14 = vadd.f32 %v975_v61, %v927_v46 }
 0x160   :  { %v1292_v21 = vpack.c.bf16 %v976_v14, %v974_v33 }
 0x162   :  { %1293 = vst [vmem:[#allocation8] sm:$0xff] %v1292_v21  }
 0x16b   :  { %v949_v34 = vpop.f32.mrf.mxu2 }
 0x16c   :  { %v998_v16 = vpop.f32.mrf.mxu3  ;;  %v950_v48 = vadd.f32 %v1835_v35, %v949_v34 }
 0x16e   :  { %v999_v28 = vadd.f32 %v998_v16, %v950_v48 }
 0x173   :  { %v951_v25 = vpop.f32.mrf.mxu2 }
 0x174   :  { %v952_v18 = vadd.f32 %v1835_v35, %v951_v25  ;;  %v1000_v49 = vpop.f32.mrf.mxu3 }
 0x176   :  { %v1001_v13 = vadd.f32 %v1000_v49, %v952_v18 }
 0x178   :  { %v1317_v5 = vpack.c.bf16 %v1001_v13, %v999_v28 }
 0x17a   :  { %1348 = vst [vmem:[#allocation8 + $0x28] sm:$0xff] %v1317_v5  }
 0x17c   :  { %v929_v50 = vpop.f32.mrf.mxu0 }
 0x17d   :  { %v978_v56 = vpop.f32.mrf.mxu1  ;;  %v930_v47 = vadd.f32 %v1835_v35, %v929_v50 }
 0x17f   :  { %v979_v54 = vadd.f32 %v978_v56, %v930_v47 }
 0x184   :  { %v931_v53 = vpop.f32.mrf.mxu0 }
 0x185   :  { %v932_v38 = vadd.f32 %v1835_v35, %v931_v53  ;;  %v980_v3 = vpop.f32.mrf.mxu1 }
 0x187   :  { %v981_v60 = vadd.f32 %v980_v3, %v932_v38 }
 0x189   :  { %v1297_v57 = vpack.c.bf16 %v981_v60, %v979_v54 }
 0x18b   :  { %1344 = vst [vmem:[#allocation8 + $0x8] sm:$0xff] %v1297_v57  }
 0x199   :  { %v954_v44 = vpop.f32.mrf.mxu2 }
 0x19a   :  { %v1003_v8 = vpop.f32.mrf.mxu3  ;;  %v955_v45 = vadd.f32 %v1835_v35, %v954_v44 }
 0x19c   :  { %v1004_v30 = vadd.f32 %v1003_v8, %v955_v45 }
 0x1a1   :  { %v956_v59 = vpop.f32.mrf.mxu2 }
 0x1a2   :  { %v957_v58 = vadd.f32 %v1835_v35, %v956_v59  ;;  %v1005_v9 = vpop.f32.mrf.mxu3 }
 0x1a4   :  { %v1006_v42 = vadd.f32 %v1005_v9, %v957_v58 }
 0x1a5   :  { %v934_v10 = vpop.f32.mrf.mxu0 }
 0x1a6   :  { %v1322_v2 = vpack.c.bf16 %v1006_v42, %v1004_v30  ;;  %v983_v15 = vpop.f32.mrf.mxu1  ;;  %v935_v7 = vadd.f32 %v1835_v35, %v934_v10 }
 0x1a8   :  { %1349 = vst [vmem:[#allocation8 + $0x30] sm:$0xff] %v1322_v2   ;;  %v984_v41 = vadd.f32 %v983_v15, %v935_v7 }
 0x1ad   :  { %v936_v11 = vpop.f32.mrf.mxu0 }
 0x1ae   :  { %v937_v1 = vadd.f32 %v1835_v35, %v936_v11  ;;  %v985_v0 = vpop.f32.mrf.mxu1 }
 0x1b0   :  { %v986_v22 = vadd.f32 %v985_v0, %v937_v1 }
 0x1b2   :  { %v1302_v39 = vpack.c.bf16 %v986_v22, %v984_v41 }
 0x1b4   :  { %1345 = vst [vmem:[#allocation8 + $0x10] sm:$0xff] %v1302_v39  }
 0x1c2   :  { %v959_v23 = vpop.f32.mrf.mxu2 }
 0x1c3   :  { %v1008_v12 = vpop.f32.mrf.mxu3  ;;  %v960_v51 = vadd.f32 %v1835_v35, %v959_v23 }
 0x1c5   :  { %v1009_v36 = vadd.f32 %v1008_v12, %v960_v51 }
 0x1ca   :  { %v961_v24 = vpop.f32.mrf.mxu2 }
 0x1cb   :  { %v962_v32 = vadd.f32 %v1835_v35, %v961_v24  ;;  %v1010_v4 = vpop.f32.mrf.mxu3 }
 0x1cd   :  { %v1011_v40 = vadd.f32 %v1010_v4, %v962_v32 }
 0x1cf   :  { %v1327_v52 = vpack.c.bf16 %v1011_v40, %v1009_v36 }
 0x1d1   :  { %1350 = vst [vmem:[#allocation8 + $0x38] sm:$0xff] %v1327_v52  }
 0x1d3   :  { %v939_v55 = vpop.f32.mrf.mxu0 }
 0x1d4   :  { %v988_v31 = vpop.f32.mrf.mxu1  ;;  %v940_v37 = vadd.f32 %v1835_v35, %v939_v55 }
 0x1d6   :  { %v989_v63 = vadd.f32 %v988_v31, %v940_v37 }
 0x1db   :  { %v941_v6 = vpop.f32.mrf.mxu0 }
 0x1dc   :  { %v942_v62 = vadd.f32 %v1835_v35, %v941_v6  ;;  %v990_v29 = vpop.f32.mrf.mxu1 }
 0x1de   :  { %v991_v20 = vadd.f32 %v990_v29, %v942_v62 }
 0x1e0   :  { %v1307_v26 = vpack.c.bf16 %v991_v20, %v989_v63 }
 0x1e2   :  { %1346 = vst [vmem:[#allocation8 + $0x18] sm:$0xff] %v1307_v26  }
 0x1e3   :  { %1057 = dma.vmem_to_hbm [thread:$0]  %s1050_s24, 1024, %s1052_s27, [#allocation5], %s1484_s20, %s1484_s20, %s1485_s21  }
 0x1e4   :  { %1481 = dma.done.wait [#allocation5], 1024  }
 0x1e5   :  { %1482 = vsyncadd [#allocation5], 4294966272 }
 0x1e6   :  { %1062 = vsyncpa [#allocation4], 1 }
 0x1e7   :  { %1063 = vsyncpa [#allocation7], 1 }
 0x1e8   :  { %1064 = vsyncpa [#allocation5], 1 }

</bundles_post_ra>
